<compile_context>
chip_gen: v6e
topology: v6e:2x2x1
jax: 0.10.0
libtpu: 0.0.40
codegen_flags: <defaults>
</compile_context>

<pallas_src>
import functools

import jax
import jax.numpy as jnp
from jax.experimental import pallas as pl
from jax.experimental.pallas import tpu as pltpu


def _round_up(x, m):
    return (x + m - 1) // m * m


def _irm_mse_kernel(len_ref, wav_ref, y_ref, basis_ref, out_ref, *,
                    tile_frames, ftiles_per_chunk):
    """One (batch b, chunk c, frame-tile f) grid step.

    wav_ref  : (1, 2, TFr, n_fft) bf16  -- [clean; noise] raw frames (window folded in bases)
    y_ref    : (1, TFr, 128)      bf16  -- net output, freq zero-padded to 128 lanes
    basis_ref: (n_fft, 256)       bf16  -- [win*cos | -win*sin], each zero-padded to 128 lanes
    out_ref  : (1, 1, 8, 128)     f32   -- per-(batch, chunk) partial sums of squared error
    """
    b = pl.program_id(0)
    c = pl.program_id(1)
    f = pl.program_id(2)

    @pl.when(f == 0)
    def _():
        out_ref[...] = jnp.zeros_like(out_ref)

    n_lanes = basis_ref.shape[-1] // 2                                   # 128

    # Two MXU matmuls (M=TFr, K=n_fft, N=256) with f32 accumulation; no concat/copy
    # and no sublane slicing of the result.
    spec_c = jnp.dot(wav_ref[0, 0], basis_ref[...],
                     preferred_element_type=jnp.float32)                 # (TFr, 256)
    spec_n = jnp.dot(wav_ref[0, 1], basis_ref[...],
                     preferred_element_type=jnp.float32)                 # (TFr, 256)

    re_c, im_c = spec_c[:, :n_lanes], spec_c[:, n_lanes:]                # 128-lane aligned
    re_n, im_n = spec_n[:, :n_lanes], spec_n[:, n_lanes:]

    mag_c = jnp.sqrt(re_c * re_c + im_c * im_c)
    mag_n = jnp.sqrt(re_n * re_n + im_n * im_n)
    # EUP approximate reciprocal keeps the divide off the VALU; padded lanes stay 0.
    irm = mag_c * pl.reciprocal(mag_c + mag_n + 1e-8, approx=True)

    y = y_ref[0].astype(jnp.float32)                                     # bf16 -> f32 upcast

    # Valid-frame mask computed per row only; broadcast across lanes by the multiply.
    frame0 = (c * ftiles_per_chunk + f) * tile_frames
    fr_idx = frame0 + jax.lax.broadcasted_iota(jnp.int32, (tile_frames, 1), 0)
    valid = (fr_idx < len_ref[b]).astype(jnp.float32)                    # (TFr, 1)

    d = (y - irm) * valid
    d2 = d * d
    # Fold rows into an (8, 128) partial with pure VALU adds; the final reduce happens
    # once in the wrapper (no per-step cross-lane XLU reduction, no masked scalar store).
    partial = jnp.sum(d2.reshape(tile_frames // 8, 8, n_lanes), axis=0)
    out_ref[...] += partial[None, None]


@functools.partial(jax.jit, static_argnames=("mode", "n_fft", "hop", "frame_tile"))
def _mse_irm_impl(net_output, clean_wave, mixture_wave, length, *,
                  mode, n_fft, hop, frame_tile):
    B, T = clean_wave.shape
    n_freq = n_fft // 2 + 1
    NP = 128                                            # lane-dense padded freq axis
    n_frames = (T - n_fft) // hop + 1

    # --- frame-axis tiling / chunking ------------------------------------------------
    tfr = min(_round_up(frame_tile, 16), _round_up(n_frames, 16))   # bf16 sublane mult.
    n_ftiles = -(-n_frames // tfr)
    nchunk = 2 if n_ftiles >= 2 else 1                  # >=2 parallel units for v7x 2xTC
    ftiles_per_chunk = -(-n_ftiles // nchunk)
    fp = nchunk * ftiles_per_chunk * tfr                # padded frame count

    # --- frames: no gather.  hop == n_fft/2 -> half-slab reshape + shifted concat ----
    if n_fft == 2 * hop:
        n_half = n_frames + 1
        used = n_half * hop
        clean_f = clean_wave[:, :used].astype(jnp.float32)
        noise_f = mixture_wave[:, :used].astype(jnp.float32) - clean_f   # subtract in f32
        h = jnp.stack([clean_f, noise_f], axis=1).astype(jnp.bfloat16)   # single bf16 cast
        h = h.reshape(B, 2, n_half, hop)
        h = jnp.pad(h, ((0, 0), (0, 0), (0, fp + 1 - n_half), (0, 0)))   # cheap half-slab pad
        frames_cn = jnp.concatenate([h[:, :, :fp], h[:, :, 1:fp + 1]], axis=-1)
    else:
        # TODO(synk): generic-hop fallback keeps the XLA gather (not the assumed config).
        idx = jnp.arange(n_frames)[:, None] * hop + jnp.arange(n_fft)[None, :]
        clean_f = clean_wave.astype(jnp.float32)
        noise_f = mixture_wave.astype(jnp.float32) - clean_f
        frames_cn = jnp.stack([clean_f[:, idx], noise_f[:, idx]], axis=1).astype(jnp.bfloat16)
        frames_cn = jnp.pad(frames_cn, ((0, 0), (0, 0), (0, fp - n_frames), (0, 0)))

    # --- net output: bf16, freq padded 65 -> 128 lanes, frames padded to fp ----------
    y_pad = jnp.pad(net_output.astype(jnp.bfloat16),
                    ((0, 0), (0, fp - n_frames), (0, NP - n_freq)))

    # --- windowed DFT bases, [cos | -sin] along lanes, bf16, resident in VMEM --------
    n = jnp.arange(n_fft, dtype=jnp.float32)
    window = 0.5 - 0.5 * jnp.cos(2.0 * jnp.pi * n / n_fft)          # periodic Hann
    fbin = jnp.arange(n_freq, dtype=jnp.float32)
    ang = 2.0 * jnp.pi * n[:, None] * fbin[None, :] / n_fft
    cos_b = jnp.pad(jnp.cos(ang) * window[:, None], ((0, 0), (0, NP - n_freq)))
    sin_b = jnp.pad(-jnp.sin(ang) * window[:, None], ((0, 0), (0, NP - n_freq)))
    basis = jnp.concatenate([cos_b, sin_b], axis=1).astype(jnp.bfloat16)     # (n_fft, 256)

    # --- sample-length -> frame-length (as calcRealIRM would return) -----------------
    if length is None:
        length_frames = jnp.full((B,), n_frames, dtype=jnp.int32)
        item_num = jnp.float32(B * n_frames * n_freq)
        time_num = jnp.float32(B * n_frames)
    else:
        length = jnp.asarray(length, dtype=jnp.int32)
        length_frames = jnp.clip((length - n_fft) // hop + 1, 0, n_frames).astype(jnp.int32)
        item_num = jnp.sum(length_frames).astype(jnp.float32) * jnp.float32(n_freq)
        time_num = jnp.sum(length_frames).astype(jnp.float32)

    grid_spec = pltpu.PrefetchScalarGridSpec(
        num_scalar_prefetch=1,
        grid=(B, nchunk, ftiles_per_chunk),
        in_specs=[
            pl.BlockSpec((1, 2, tfr, n_fft),
                         lambda b, c, f, L: (b, 0, c * ftiles_per_chunk + f, 0)),   # frames
            pl.BlockSpec((1, tfr, NP),
                         lambda b, c, f, L: (b, c * ftiles_per_chunk + f, 0)),      # net out
            pl.BlockSpec((n_fft, 2 * NP), lambda b, c, f, L: (0, 0)),               # bases
        ],
        out_specs=pl.BlockSpec((1, 1, 8, NP), lambda b, c, f, L: (b, c, 0, 0)),
    )

    partial = pl.pallas_call(
        functools.partial(_irm_mse_kernel, tile_frames=tfr,
                          ftiles_per_chunk=ftiles_per_chunk),
        out_shape=jax.ShapeDtypeStruct((B, nchunk, 8, NP), jnp.float32),
        grid_spec=grid_spec,
        compiler_params=pltpu.CompilerParams(
            dimension_semantics=("parallel", "parallel", "arbitrary")),
    )(length_frames, frames_cn, y_pad, basis)

    mse_sum = jnp.sum(partial)          # tiny (B, nchunk, 8, 128) reduce in the wrapper

    if mode == "correct":
        mse_loss = mse_sum / item_num
    elif mode == "error":
        mse_loss = mse_sum / time_num
    else:
        raise ValueError("unknown mode: {}".format(mode))

    # Matches the reference: loss_item is always mse_sum / item_num.
    loss_item = jnp.reshape(mse_sum / item_num, (1,)).astype(jnp.float32)
    return mse_loss, loss_item


def misp_batch_cal_mse_calc_irm_label(net_output, clean_wave, mixture_wave,
                                      length=None, mode="correct",
                                      n_fft=128, hop=64, frame_tile=2048):
    """JAX/Pallas equivalent of misp_BatchCalMSE_calcIRMLabel.forward."""
    return _mse_irm_impl(net_output, clean_wave, mixture_wave, length,
                         mode=mode, n_fft=n_fft, hop=hop, frame_tile=frame_tile)


def _reference_loss(net_output, clean_wave, mixture_wave, length, n_fft, hop):
    """Pure-JAX f32 reference (mode='correct') for sanity checking."""
    B, T = clean_wave.shape
    n_freq = n_fft // 2 + 1
    n_frames = (T - n_fft) // hop + 1
    n = jnp.arange(n_fft, dtype=jnp.float32)
    window = 0.5 - 0.5 * jnp.cos(2.0 * jnp.pi * n / n_fft)
    idx = jnp.arange(n_frames)[:, None] * hop + jnp.arange(n_fft)[None, :]
    noise_wave = mixture_wave - clean_wave
    mag_c = jnp.abs(jnp.fft.rfft(clean_wave[:, idx] * window, axis=-1))
    mag_n = jnp.abs(jnp.fft.rfft(noise_wave[:, idx] * window, axis=-1))
    irm = mag_c / (mag_c + mag_n + 1e-8)
    if length is None:
        mask = jnp.ones_like(irm)
        item_num = float(B * n_frames * n_freq)
    else:
        lf = jnp.clip((jnp.asarray(length, jnp.int32) - n_fft) // hop + 1, 0, n_frames)
        mask = (jnp.arange(n_frames)[None, :, None] < lf[:, None, None]).astype(jnp.float32)
        item_num = float(jnp.sum(lf)) * float(n_freq)
    d = (net_output - irm) * mask
    return float(jnp.sum(d * d) / item_num)


if __name__ == "__main__":
    key = jax.random.PRNGKey(0)
    k_clean, k_noise, k_out = jax.random.split(key, 3)

    B = 2
    n_fft, hop = 128, 64
    T = n_fft + 7 * hop                     # 576 samples -> 8 frames
    n_freq = n_fft // 2 + 1                 # 65
    n_frames = (T - n_fft) // hop + 1       # 8

    clean_wave = jax.random.normal(k_clean, (B, T), dtype=jnp.float32)
    noise_wave = 0.5 * jax.random.normal(k_noise, (B, T), dtype=jnp.float32)
    mixture_wave = clean_wave + noise_wave
    net_output = jax.random.uniform(k_out, (B, n_frames, n_freq), dtype=jnp.float32)
    length = jnp.array([T, 400], dtype=jnp.int32)   # per-utterance valid sample counts

    loss, loss_item = misp_batch_cal_mse_calc_irm_label(
        net_output, clean_wave, mixture_wave, length=length, mode="correct",
        n_fft=n_fft, hop=hop)
    jax.block_until_ready((loss, loss_item))

    # Also exercise the length=None path once.
    loss2, _ = misp_batch_cal_mse_calc_irm_label(
        net_output, clean_wave, mixture_wave, length=None, mode="correct",
        n_fft=n_fft, hop=hop)
    jax.block_until_ready(loss2)

    # Loose sanity check vs pure-JAX f32 reference (bf16 MXU inputs -> small drift).
    ref1 = _reference_loss(net_output, clean_wave, mixture_wave, length, n_fft, hop)
    ref2 = _reference_loss(net_output, clean_wave, mixture_wave, None, n_fft, hop)
    assert abs(float(loss) - ref1) <= 0.08 * abs(ref1) + 1e-5, (float(loss), ref1)
    assert abs(float(loss2) - ref2) <= 0.08 * abs(ref2) + 1e-5, (float(loss2), ref2)

    print("KERNEL_OK")
</pallas_src>

<mosaic_0001>
module attributes {stable_mosaic.version = 11 : i64} {
  func.func @_irm_mse_kernel(%arg0: i32, %arg1: i32, %arg2: i32, %arg3: memref<2xi32, #tpu.memory_space<smem>>, %arg4: memref<1x2x16x128xbf16, #tpu.memory_space<vmem>>, %arg5: memref<1x16x128xbf16, #tpu.memory_space<vmem>>, %arg6: memref<128x256xbf16, #tpu.memory_space<vmem>>, %arg7: memref<1x1x8x128xf32, #tpu.memory_space<vmem>>) attributes {dimension_semantics = [#tpu.dimension_semantics<parallel>, #tpu.dimension_semantics<parallel>, #tpu.dimension_semantics<arbitrary>], iteration_bounds = array<i64: 2, 1, 1>, scalar_prefetch = 1 : i64, scratch_operands = 0 : i64, tpu.core_type = #tpu.core_type<tc>, window_params = [{transform_indices = @transform_0, window_bounds = array<i64: 1, 2, 16, 128>}, {transform_indices = @transform_1, window_bounds = array<i64: 1, 16, 128>}, {pipeline_mode = #tpu.pipeline_mode<synchronous>, transform_indices = @transform_2, window_bounds = array<i64: 128, 256>}, {transform_indices = @transform_3, window_bounds = array<i64: 1, 1, 8, 128>}]} {
    %c0_i32 = arith.constant 0 : i32
    %0 = arith.cmpi eq, %arg2, %c0_i32 : i32
    %1 = arith.extui %0 : i1 to i32
    %c0_i32_0 = arith.constant 0 : i32
    %2 = arith.cmpi ne, %1, %c0_i32_0 : i32
    scf.if %2 {
      %cst_25 = arith.constant 0.000000e+00 : f32
      %53 = vector.broadcast %cst_25 : f32 to vector<1x1x8x128xf32>
      %c0_26 = arith.constant 0 : index
      %c0_27 = arith.constant 0 : index
      %c0_28 = arith.constant 0 : index
      %c0_29 = arith.constant 0 : index
      %54 = vector.load %arg7[%c0_26, %c0_27, %c0_28, %c0_29] : memref<1x1x8x128xf32, #tpu.memory_space<vmem>>, vector<1x1x8x128xf32>
      tpu.vector_store %arg7[%c0_26, %c0_27, %c0_28, %c0_29], %53 {strides = array<i32>} : memref<1x1x8x128xf32, #tpu.memory_space<vmem>>, vector<1x1x8x128xf32>,
    } else {
    }
    %c0 = arith.constant 0 : index
    %c0_1 = arith.constant 0 : index
    %c0_2 = arith.constant 0 : index
    %c0_3 = arith.constant 0 : index
    %3 = vector.load %arg4[%c0, %c0_1, %c0_2, %c0_3] : memref<1x2x16x128xbf16, #tpu.memory_space<vmem>>, vector<1x1x16x128xbf16>
    %4 = vector.shape_cast %3 : vector<1x1x16x128xbf16> to vector<16x128xbf16>
    %c0_4 = arith.constant 0 : index
    %c0_5 = arith.constant 0 : index
    %5 = vector.load %arg6[%c0_4, %c0_5] : memref<128x256xbf16, #tpu.memory_space<vmem>>, vector<128x256xbf16>
    %cst = arith.constant dense<0.000000e+00> : vector<16x256xf32>
    %6 = tpu.matmul %4, %5, %cst {dimension_numbers = #tpu.dot_dimension_numbers<[1], [0], [0], [1], [0, 0, 1, 1], [], []>} : vector<16x128xbf16>, vector<128x256xbf16>, vector<16x256xf32> -> vector<16x256xf32>
    %c0_6 = arith.constant 0 : index
    %c1 = arith.constant 1 : index
    %c0_7 = arith.constant 0 : index
    %c0_8 = arith.constant 0 : index
    %7 = vector.load %arg4[%c0_6, %c1, %c0_7, %c0_8] : memref<1x2x16x128xbf16, #tpu.memory_space<vmem>>, vector<1x1x16x128xbf16>
    %8 = vector.shape_cast %7 : vector<1x1x16x128xbf16> to vector<16x128xbf16>
    %c0_9 = arith.constant 0 : index
    %c0_10 = arith.constant 0 : index
    %9 = vector.load %arg6[%c0_9, %c0_10] : memref<128x256xbf16, #tpu.memory_space<vmem>>, vector<128x256xbf16>
    %cst_11 = arith.constant dense<0.000000e+00> : vector<16x256xf32>
    %10 = tpu.matmul %8, %9, %cst_11 {dimension_numbers = #tpu.dot_dimension_numbers<[1], [0], [0], [1], [0, 0, 1, 1], [], []>} : vector<16x128xbf16>, vector<128x256xbf16>, vector<16x256xf32> -> vector<16x256xf32>
    %11 = vector.extract_strided_slice %6 {offsets = [0, 0], sizes = [16, 128], strides = [1, 1]} : vector<16x256xf32> to vector<16x128xf32>
    %12 = vector.extract_strided_slice %6 {offsets = [0, 128], sizes = [16, 128], strides = [1, 1]} : vector<16x256xf32> to vector<16x128xf32>
    %13 = vector.extract_strided_slice %10 {offsets = [0, 0], sizes = [16, 128], strides = [1, 1]} : vector<16x256xf32> to vector<16x128xf32>
    %14 = vector.extract_strided_slice %10 {offsets = [0, 128], sizes = [16, 128], strides = [1, 1]} : vector<16x256xf32> to vector<16x128xf32>
    %15 = arith.mulf %11, %11 : vector<16x128xf32>
    %16 = arith.mulf %12, %12 : vector<16x128xf32>
    %17 = arith.addf %15, %16 : vector<16x128xf32>
    %18 = math.sqrt %17 : vector<16x128xf32>
    %19 = arith.mulf %13, %13 : vector<16x128xf32>
    %20 = arith.mulf %14, %14 : vector<16x128xf32>
    %21 = arith.addf %19, %20 : vector<16x128xf32>
    %22 = math.sqrt %21 : vector<16x128xf32>
    %23 = arith.addf %18, %22 : vector<16x128xf32>
    %cst_12 = arith.constant 9.99999993E-9 : f32
    %24 = vector.broadcast %cst_12 : f32 to vector<16x128xf32>
    %25 = arith.addf %23, %24 : vector<16x128xf32>
    %26 = tpu.reciprocal %25 {approx = true} : vector<16x128xf32> -> vector<16x128xf32>
    %27 = arith.mulf %18, %26 : vector<16x128xf32>
    %c0_13 = arith.constant 0 : index
    %c0_14 = arith.constant 0 : index
    %c0_15 = arith.constant 0 : index
    %28 = vector.load %arg5[%c0_13, %c0_14, %c0_15] : memref<1x16x128xbf16, #tpu.memory_space<vmem>>, vector<1x16x128xbf16>
    %29 = vector.shape_cast %28 : vector<1x16x128xbf16> to vector<16x128xbf16>
    %30 = arith.extf %29 : vector<16x128xbf16> to vector<16x128xf32>
    %c1_i32 = arith.constant 1 : i32
    %31 = arith.muli %arg1, %c1_i32 : i32
    %32 = arith.addi %31, %arg2 : i32
    %c16_i32 = arith.constant 16 : i32
    %33 = arith.muli %32, %c16_i32 : i32
    %34 = tpu.iota {dimensions = array<i32: 0>} : vector<16x1xi32>
    %35 = vector.broadcast %33 : i32 to vector<16x1xi32>
    %36 = arith.addi %35, %34 : vector<16x1xi32>
    %37 = arith.index_cast %arg0 : i32 to index
    %38 = memref.load %arg3[%37] : memref<2xi32, #tpu.memory_space<smem>>
    %39 = vector.broadcast %38 : i32 to vector<16x1xi32>
    %40 = arith.cmpi slt, %36, %39 : vector<16x1xi32>
    %41 = arith.extui %40 : vector<16x1xi1> to vector<16x1xi32>
    %42 = arith.sitofp %41 : vector<16x1xi32> to vector<16x1xf32>
    %43 = arith.subf %30, %27 : vector<16x128xf32>
    %44 = vector.broadcast %42 : vector<16x1xf32> to vector<16x128xf32>
    %45 = arith.mulf %43, %44 : vector<16x128xf32>
    %46 = arith.mulf %45, %45 : vector<16x128xf32>
    %47 = vector.shape_cast %46 : vector<16x128xf32> to vector<2x8x128xf32>
    %cst_16 = arith.constant dense<0.000000e+00> : vector<8x128xf32>
    %48 = vector.multi_reduction <add>, %47, %cst_16 [0] : vector<2x8x128xf32> to vector<8x128xf32>
    %c0_17 = arith.constant 0 : index
    %c0_18 = arith.constant 0 : index
    %c0_19 = arith.constant 0 : index
    %c0_20 = arith.constant 0 : index
    %49 = vector.load %arg7[%c0_17, %c0_18, %c0_19, %c0_20] : memref<1x1x8x128xf32, #tpu.memory_space<vmem>>, vector<1x1x8x128xf32>
    %50 = vector.shape_cast %48 : vector<8x128xf32> to vector<1x1x8x128xf32>
    %51 = arith.addf %49, %50 : vector<1x1x8x128xf32>
    %c0_21 = arith.constant 0 : index
    %c0_22 = arith.constant 0 : index
    %c0_23 = arith.constant 0 : index
    %c0_24 = arith.constant 0 : index
    %52 = vector.load %arg7[%c0_21, %c0_22, %c0_23, %c0_24] : memref<1x1x8x128xf32, #tpu.memory_space<vmem>>, vector<1x1x8x128xf32>
    tpu.vector_store %arg7[%c0_21, %c0_22, %c0_23, %c0_24], %51 {strides = array<i32>} : memref<1x1x8x128xf32, #tpu.memory_space<vmem>>, vector<1x1x8x128xf32>,
    return
  }
  func.func @transform_0(%arg0: i32, %arg1: i32, %arg2: i32, %arg3: memref<2xi32, #tpu.memory_space<smem>>) -> (i32, i32, i32, i32) {
    %c1_i32 = arith.constant 1 : i32
    %0 = arith.muli %arg1, %c1_i32 : i32
    %1 = arith.addi %0, %arg2 : i32
    %c0_i32 = arith.constant 0 : i32
    %c0_i32_0 = arith.constant 0 : i32
    %c0_i32_1 = arith.constant 0 : i32
    return %arg0, %c0_i32, %1, %c0_i32_0 : i32, i32, i32, i32
  }
  func.func @transform_1(%arg0: i32, %arg1: i32, %arg2: i32, %arg3: memref<2xi32, #tpu.memory_space<smem>>) -> (i32, i32, i32) {
    %c1_i32 = arith.constant 1 : i32
    %0 = arith.muli %arg1, %c1_i32 : i32
    %1 = arith.addi %0, %arg2 : i32
    %c0_i32 = arith.constant 0 : i32
    %c0_i32_0 = arith.constant 0 : i32
    return %arg0, %1, %c0_i32 : i32, i32, i32
  }
  func.func @transform_2(%arg0: i32, %arg1: i32, %arg2: i32, %arg3: memref<2xi32, #tpu.memory_space<smem>>) -> (i32, i32) {
    %c0_i32 = arith.constant 0 : i32
    %c0_i32_0 = arith.constant 0 : i32
    %c0_i32_1 = arith.constant 0 : i32
    return %c0_i32, %c0_i32_0 : i32, i32
  }
  func.func @transform_3(%arg0: i32, %arg1: i32, %arg2: i32, %arg3: memref<2xi32, #tpu.memory_space<smem>>) -> (i32, i32, i32, i32) {
    %c0_i32 = arith.constant 0 : i32
    %c0_i32_0 = arith.constant 0 : i32
    %c0_i32_1 = arith.constant 0 : i32
    return %arg0, %arg1, %c0_i32, %c0_i32_0 : i32, i32, i32, i32
  }
}

</mosaic_0001>

<bundles_post_ra>
// kernel: _mse_irm_impl.1
= control target key start
LH: loop header
LB: loop body
LE: loop exit
PB: predicated region body
PF: predicated region fallthrough
CT: control target
= control target key end

     0   :  { %s921_s0 = inlined_call_operand.vmem [shape: s32[2], index: 0, kind: input, shape index: {}]   ;;  %s922_s1 = inlined_call_operand.vmem [shape: bf16[2,2,16,128], index: 1, kind: input, shape index: {}]   ;;  %s923_s2 = inlined_call_operand.vmem [shape: bf16[2,16,128], index: 2, kind: input, shape index: {}]   ;;  %s924_s3 = inlined_call_operand.vmem [shape: bf16[128,256], index: 3, kind: input, shape index: {}]   ;;  %s925_s4 = inlined_call_operand.vmem [shape: f32[2,1,8,128], index: 4, kind: output, shape index: {}]  }
   0x1   :  { %s9_s17 = sshll.u32 %s921_s0, 4  ;;  %s10_s17 = int_to_ptr.vmem [resolvable:$true] %s9_s17 }
   0x2   :  { %s755_s18 = scalar_lea.vmem %s10_s17, 16  ;;  %p760_p1 = scmp.lt.s32.totalorder %s10_s17, %s10_s17 }
   0x3   :  { %p756_p0 = scmp.ne.s32.totalorder %s10_s17, %s755_s18  ;;  %p761_p2 = scmp.lt.s32.totalorder %s755_s18, %s755_s18 }
   0x5   :  { %p762_p3 = por %p761_p2, %p760_p1 }
   0x7   :  { %p763_p4 = pnand %p762_p3, %p756_p0 }
   0x9   :  { %766 = shalt.err (!%p763_p4)  }
   0xa   :  { %s793_s19 = smov [#allocation3]  }
   0xb   :  { %12 = dma.vmem_to_smem %s10_s17, 16, %s793_s19, [#allocation2] }
   0xc   :  { %779 = dma.done.wait [#allocation2], 16 }
   0xd   :  { %780 = vsyncadd [#allocation2], 4294967280 }
   0xe   :  { %14 = sfence }
   0xf   :  { %s824_s20 = smov 0   ;;  %s826_s21 = smov 0  }
  0x10   :  { %s828_s22 = smov 0  }
  0x11 LB: > { %s39_s0 = sadd.s32 1, %s787_s21  ;;  %p654_p5 = scmp.ge.s32.totalorder %s791_s22, 1  ;;  %s791_s22 = sphi %s828_s22, %s20_s22   ;;  %s787_s21 = sphi %s826_s21, %s927_s21   ;;  %s783_s20 = sphi %s824_s20, %s926_s20  }
  0x12   : > { %p41_p6 = scmp.ge.s32.totalorder %s39_s0, 2  ;;  %p197_p7 = scmp.lt.s32.totalorder %s791_s22, 3 }
  0x14   : > { %s929_s0 = smov (%p41_p6, %s39_s0), 0  ;;  %p198_p8 = pnand %p654_p5, %p197_p7 }
  0x15   : > { %p240_p9 = scmp.lt.s32.totalorder (!%p198_p8), %s783_s20, 1  ;;  %s534_s13 = sld [smem:[#allocation3 + %s783_s20]] (!%p198_p8) }
  0x16   : > { %201 = sbr.rel (%p198_p8) target bundleno = 312 (0x138), region = 32 }
  0x1b   : > { %v717_v0 = vld [vmem:[%s924_s3 + $0x74] ss:$8 sps:$4 sm:$0xff]   ;;  %v719_v1 = vld [vmem:[%s924_s3 + $0x70] ss:$8 sps:$4 sm:$0xff]   ;;  %v794_v2 = vmov 0   ;;  %s855_s29 = scalar_select %p240_p9, %s783_s20, 1  ;;  %v528_v63 = vlaneseq }
  0x1c   : > { %411 = vmatprep.mubr.bf16.mxu0 %v794_v2  ;;  %463 = vmatprep.mubr.bf16.mxu1 %v794_v2  ;;  %v720_v3 = vld [vmem:[%s924_s3 + $0x64] ss:$8 sps:$4 sm:$0xff]   ;;  %v722_v4 = vld [vmem:[%s924_s3 + $0x60] ss:$8 sps:$4 sm:$0xff]   ;;  %v723_v5 = vld [vmem:[%s924_s3 + $0x54] ss:$8 sps:$4 sm:$0xff]  }
  0x1d   : > { %379 = vmatprep.subr.bf16.mxu0 %v717_v0  ;;  %431 = vmatprep.subr.bf16.mxu1 %v717_v0  ;;  %s684_s8 = sshll.u32 %s855_s29, 4  ;;  %v725_v6 = vld [vmem:[%s924_s3 + $0x50] ss:$8 sps:$4 sm:$0xff]   ;;  %v726_v7 = vld [vmem:[%s924_s3 + $0x44] ss:$8 sps:$4 sm:$0xff]   ;;  %s685_s12 = sshll.u32 %s855_s29, 3 }
  0x1e   : > { %380 = vmatpush1.bf16.msra.mxu0 %v719_v1  ;;  %432 = vmatpush1.bf16.msra.mxu1 %v719_v1  ;;  %s873_s15 = scalar_lea.vmem %s922_s1, %s684_s8  ;;  %v728_v8 = vld [vmem:[%s924_s3 + $0x40] ss:$8 sps:$4 sm:$0xff]   ;;  %v729_v9 = vld [vmem:[%s924_s3 + $0x34] ss:$8 sps:$4 sm:$0xff]   ;;  %v731_v10 = vld [vmem:[%s924_s3 + $0x30] ss:$8 sps:$4 sm:$0xff]   ;;  %s259_s16 = scalar_lea.vmem %s923_s2, %s685_s12 }
  0x1f   : > { %381 = vmatprep.subr.bf16.mxu0 %v720_v3  ;;  %433 = vmatprep.subr.bf16.mxu1 %v720_v3  ;;  %v732_v11 = vld [vmem:[%s924_s3 + $0x24] ss:$8 sps:$4 sm:$0xff]   ;;  %v734_v12 = vld [vmem:[%s924_s3 + $0x20] ss:$8 sps:$4 sm:$0xff]   ;;  %v735_v13 = vld [vmem:[%s924_s3 + $0x14] ss:$8 sps:$4 sm:$0xff]   ;;  %v535_v3 = vstv %s534_s13  ;;  %s268_s17 = scalar_lea.vmem %s925_s4, %s685_s12 }
  0x20   : > { %v737_v14 = vld [vmem:[%s924_s3 + $0x10] ss:$8 sps:$4 sm:$0xff]   ;;  %v738_v15 = vld [vmem:[%s924_s3 + $0x4] ss:$8 sps:$4 sm:$0xff]   ;;  %v740_v16 = vld [vmem:[%s924_s3] ss:$8 sps:$4 sm:$0xff]  }
  0x21   : > { %v741_v17 = vld [vmem:[%s873_s15] sm:$0xff]   ;;  %v742_v18 = vld [vmem:[%s873_s15 + $0x8] sm:$0xff]   ;;  %v529_v1 = vshrl.u32 %v528_v63, 7 }
  0x22   : > { %382 = vmatpush1.bf16.msra.mxu0 %v722_v4  ;;  %434 = vmatpush1.bf16.msra.mxu1 %v722_v4  ;;  %v687_v0 = vld [vmem:[%s259_s16] sm:$0xff]  }
  0x23   : > { %383 = vmatprep.subr.bf16.mxu0 %v723_v5  ;;  %435 = vmatprep.subr.bf16.mxu1 %v723_v5  ;;  %v688_v4 = vunpack.c.l.bf16 %v687_v0  ;;  %v530_v5 = vadd.s32 8, %v529_v1  ;;  %vm536_vm8 = vcmp.lt.s32.totalorder %v529_v1, %v535_v3 }
  0x25   : > { %vm537_vm9 = vcmp.lt.s32.totalorder %v530_v5, %v535_v3 }
  0x26   : > { %384 = vmatpush1.bf16.msra.mxu0 %v725_v6  ;;  %436 = vmatpush1.bf16.msra.mxu1 %v725_v6 }
  0x27   : > { %385 = vmatprep.subr.bf16.mxu0 %v726_v7  ;;  %437 = vmatprep.subr.bf16.mxu1 %v726_v7  ;;  %v689_v7 = vunpack.c.h.bf16 %v687_v0 }
  0x2a   : > { %386 = vmatpush1.bf16.msra.mxu0 %v728_v8  ;;  %438 = vmatpush1.bf16.msra.mxu1 %v728_v8 }
  0x2b   : > { %387 = vmatprep.subr.bf16.mxu0 %v729_v9  ;;  %439 = vmatprep.subr.bf16.mxu1 %v729_v9 }
  0x2e   : > { %388 = vmatpush1.bf16.msra.mxu0 %v731_v10  ;;  %440 = vmatpush1.bf16.msra.mxu1 %v731_v10  ;;  %v795_v10 = vmov 0.0  }
  0x2f   : > { %389 = vmatprep.subr.bf16.mxu0 %v732_v11  ;;  %441 = vmatprep.subr.bf16.mxu1 %v732_v11  ;;  %v680_v11 = vsel %vm536_vm8, 1.0, %v795_v10 }
  0x32   : > { %390 = vmatpush1.bf16.msra.mxu0 %v734_v12  ;;  %442 = vmatpush1.bf16.msra.mxu1 %v734_v12 }
  0x33   : > { %391 = vmatprep.subr.bf16.mxu0 %v735_v13  ;;  %443 = vmatprep.subr.bf16.mxu1 %v735_v13  ;;  %v681_v13 = vsel %vm537_vm9, 1.0, %v795_v10 }
  0x36   : > { %392 = vmatpush1.bf16.msra.mxu0 %v737_v14  ;;  %444 = vmatpush1.bf16.msra.mxu1 %v737_v14 }
  0x37   : > { %393 = vmatprep.subr.bf16.mxu0 %v738_v15  ;;  %445 = vmatprep.subr.bf16.mxu1 %v738_v15 }
  0x3a   : > { %394 = vmatpush1.bf16.msra.mxu0 %v740_v16  ;;  %446 = vmatpush1.bf16.msra.mxu1 %v740_v16 }
  0x3d   : > { %412 = vmatmul.mubr.bf16.vlgmr.msra.gmra.mxu0 %v741_v17  ;;  %464 = vmatmul.mubr.bf16.vlgmr.msra.gmra.mxu1 %v742_v18 }
  0xfd   : > { %v413_v19 = vpop.f32.mrf.mxu0  ;;  %v465_v20 = vpop.f32.mrf.mxu1 }
  0xfe   : > { %v474_v23 = vmul.f32 %v413_v19, %v413_v19  ;;  %v494_v24 = vmul.f32 %v465_v20, %v465_v20 }
  0xff   : > { %v415_v21 = vpop.f32.mrf.mxu0  ;;  %v467_v22 = vpop.f32.mrf.mxu1 }
 0x100   : > { %v476_v25 = vmul.f32 %v415_v21, %v415_v21  ;;  %v496_v26 = vmul.f32 %v467_v22, %v467_v22 }
 0x101   : > { %v417_v27 = vpop.f32.mrf.mxu0  ;;  %v469_v28 = vpop.f32.mrf.mxu1 }
 0x102   : > { %v478_v29 = vadd.f32 %v476_v25, %v474_v23  ;;  %v498_v30 = vadd.f32 %v496_v26, %v494_v24  ;;  %v475_v33 = vmul.f32 %v417_v27, %v417_v27  ;;  %v495_v34 = vmul.f32 %v469_v28, %v469_v28 }
 0x103   : > { %v419_v31 = vpop.f32.mrf.mxu0  ;;  %v471_v32 = vpop.f32.mrf.mxu1 }
 0x104   : > { %743 = vrsqrt.f32 %v478_v29  ;;  %v477_v35 = vmul.f32 %v419_v31, %v419_v31  ;;  %v497_v36 = vmul.f32 %v471_v32, %v471_v32  ;;  %vm482_vm0 = vcmp.eq.f32.partialorder %v478_v29, inf }
 0x105   : > { %745 = vrsqrt.f32 %v498_v30  ;;  %v485_v42 = vand.u32 2147483648, %v478_v29  ;;  %vm484_vm1 = vcmp.eq.f32.partialorder %v478_v29, 0.0  ;;  %vm502_vm2 = vcmp.eq.f32.partialorder %v498_v30, inf }
 0x106   : > { %v479_v37 = vadd.f32 %v477_v35, %v475_v33  ;;  %v499_v38 = vadd.f32 %v497_v36, %v495_v34  ;;  %v505_v45 = vand.u32 2147483648, %v498_v30  ;;  %vm504_vm3 = vcmp.eq.f32.partialorder %v498_v30, 0.0 }
 0x108   : > { %747 = vrsqrt.f32 %v479_v37  ;;  %vm489_vm4 = vcmp.eq.f32.partialorder %v479_v37, inf  ;;  %v492_v54 = vand.u32 2147483648, %v479_v37  ;;  %vm491_vm5 = vcmp.eq.f32.partialorder %v479_v37, 0.0 }
 0x109   : > { %749 = vrsqrt.f32 %v499_v38  ;;  %vm509_vm6 = vcmp.eq.f32.partialorder %v499_v38, inf  ;;  %v512_v57 = vand.u32 2147483648, %v499_v38  ;;  %vm511_vm7 = vcmp.eq.f32.partialorder %v499_v38, 0.0 }
 0x111   : > { %v744_v39 = vpop.eup %743 }
 0x112   : > { %v746_v40 = vpop.eup %745  ;;  %v481_v41 = vmul.f32 %v744_v39, %v478_v29 }
 0x113   : > { %v501_v43 = vmul.f32 %v746_v40, %v498_v30 }
 0x114   : > { %v483_v44 = vsel %vm482_vm0, %v478_v29, %v481_v41 }
 0x115   : > { %v486_v46 = vsel %vm484_vm1, %v485_v42, %v483_v44  ;;  %v503_v47 = vsel %vm502_vm2, %v498_v30, %v501_v43  ;;  %v748_v49 = vpop.eup %747 }
 0x116   : > { %v506_v48 = vsel %vm504_vm3, %v505_v45, %v503_v47  ;;  %v750_v51 = vpop.eup %749  ;;  %v488_v52 = vmul.f32 %v748_v49, %v479_v37 }
 0x117   : > { %v514_v50 = vadd.f32 %v506_v48, %v486_v46  ;;  %v508_v55 = vmul.f32 %v750_v51, %v499_v38 }
 0x118   : > { %v490_v56 = vsel %vm489_vm4, %v479_v37, %v488_v52 }
 0x119   : > { %v516_v53 = vadd.f32 1e-08, %v514_v50  ;;  %v493_v58 = vsel %vm491_vm5, %v492_v54, %v490_v56  ;;  %v510_v59 = vsel %vm509_vm6, %v499_v38, %v508_v55 }
 0x11a   : > { %v513_v60 = vsel %vm511_vm7, %v512_v57, %v510_v59 }
 0x11b   : > { %751 = vrcp.f32 %v516_v53  ;;  %v515_v61 = vadd.f32 %v513_v60, %v493_v58 }
 0x11d   : > { %v517_v62 = vadd.f32 1e-08, %v515_v61 }
 0x11f   : > { %753 = vrcp.f32 %v517_v62 }
 0x128   : > { %v752_v2 = vpop.eup %751 }
 0x129   : > { %v520_v6 = vmul.f32 %v752_v2, %v486_v46 }
 0x12b   : > { %v542_v8 = vsub.f32 %v688_v4, %v520_v6 }
 0x12c   : > { %v754_v9 = vpop.eup %753 }
 0x12d   : > { %v521_v12 = vmul.f32 %v754_v9, %v493_v58  ;;  %v544_v14 = vmul.f32 %v680_v11, %v542_v8 }
 0x12f   : > { %v543_v15 = vsub.f32 %v689_v7, %v521_v12  ;;  %v546_v17 = vmul.f32 %v544_v14, %v544_v14 }
 0x131   : > { %v545_v16 = vmul.f32 %v681_v13, %v543_v15 }
 0x133   : > { %v547_v18 = vmul.f32 %v545_v16, %v545_v16 }
 0x135   : > { %v548_v19 = vadd.f32 %v547_v18, %v546_v17 }
 0x137   : > { %551 = vst [vmem:[%s268_s17] sm:$0xff] %v548_v19 }
 0x138 PF: > { %s20_s22 = sadd.s32 1, %s791_s22   ;;  %s926_s20 = smov %s787_s21 }
 0x139   : > { %p17_p10 = scmp.ge.s32.totalorder %s20_s22, 4   ;;  %s927_s21 = smov %s929_s0 }
 0x13b   :  { %19 = sbr.rel (!%p17_p10) target bundleno = 17 (0x11), region = 70 }

</bundles_post_ra>
